<compile_context>
chip_gen: v5e
topology: v5e:2x2
jax: 0.10.0
libtpu: 0.0.40
codegen_flags: <defaults>
</compile_context>

<pallas_src>
import math
import numpy as np

import jax
import jax.numpy as jnp
from jax.experimental import pallas as pl
from jax.experimental.pallas import tpu as pltpu

VGG19_CFG = [4, 4, 'M', 8, 8, 'M', 16, 16, 16, 16, 'M', 32, 32, 32, 32, 'M', 32, 32, 32, 32, 'M']
IN_CHANNELS = 3
NUM_CLASSES = 10
NUM_CLASSES_PAD = 16          # sublane-padded logits rows; sliced back to 10 outside the kernel
HIDDEN = 1024
IMG = 32

# 3x3 taps, row-major: t = (dy+1)*3 + (dx+1)  (matches HWIO weight layout)
OFFS = [(dy, dx) for dy in (-1, 0, 1) for dx in (-1, 0, 1)]


def _pad8(c):
    return ((c + 7) // 8) * 8


# --------------------------------------------------------------------------- host-side constants
def _make_masks(H, W):
    """(9, 1, H*W) f32: 1 where tap (dy,dx) reads inside the image (SAME zero padding)."""
    m = np.zeros((9, 1, H * W), np.float32)
    for t, (dy, dx) in enumerate(OFFS):
        for y in range(H):
            if not (0 <= y + dy < H):
                continue
            for x in range(W):
                if 0 <= x + dx < W:
                    m[t, 0, y * W + x] = 1.0
    return m


def _make_shift_mats(H, W):
    """(9, HW, HW) f32 with taps_t = act @ T_t, i.e. taps_t[:, hw] = act[:, hw + dy*W + dx] (0 outside)."""
    HW = H * W
    T = np.zeros((9, HW, HW), np.float32)
    for t, (dy, dx) in enumerate(OFFS):
        for y in range(H):
            for x in range(W):
                yy, xx = y + dy, x + dx
                if 0 <= yy < H and 0 <= xx < W:
                    T[t, yy * W + xx, y * W + x] = 1.0
    return T


def _make_pool_select(H, W):
    """(HW, HW/4) f32 0/1: pooled = m2 @ S picks the 2x2-window max sitting at (2yo, 2xo)."""
    Ho, Wo = H // 2, W // 2
    S = np.zeros((H * W, Ho * Wo), np.float32)
    for yo in range(Ho):
        for xo in range(Wo):
            S[(2 * yo) * W + 2 * xo, yo * Wo + xo] = 1.0
    return S


def _make_pool_gathers(H, W):
    """(4, HW, HW/4) f32 0/1: pooled = max_p (act @ G_p)  -- 2x2/2 maxpool for small maps."""
    Ho, Wo = H // 2, W // 2
    G = np.zeros((4, H * W, Ho * Wo), np.float32)
    for p, (dy, dx) in enumerate([(0, 0), (0, 1), (1, 0), (1, 1)]):
        for yo in range(Ho):
            for xo in range(Wo):
                G[p, (2 * yo + dy) * W + (2 * xo + dx), yo * Wo + xo] = 1.0
    return G


def _blockdiag(M, B):
    """kron(I_B, M): per-image 0/1 matrix -> block-diagonal matrix over B lane-packed images."""
    return np.kron(np.eye(B, dtype=np.float32), M)


def _pack_conv(w, b, cin, cout, cin_p, cout_p):
    """HWIO (3,3,cin,cout) -> (cout_p, 9*cin_p) bf16 matching in-kernel tap order; bias -> (cout_p,1) f32."""
    w9 = np.zeros((cout_p, 9 * cin_p), np.float32)
    wr = np.asarray(w, np.float32).reshape(9, cin, cout)
    for t in range(9):
        w9[:cout, t * cin_p:t * cin_p + cin] = wr[t].T
    bb = np.zeros((cout_p, 1), np.float32)
    bb[:cout, 0] = np.asarray(b, np.float32)
    return jnp.asarray(w9, jnp.bfloat16), jnp.asarray(bb, jnp.float32)


# --------------------------------------------------------------------------- pltpu.roll direction probe
# Correctness of the sign convention is additionally pinned by the end-to-end reference
# check in __main__ (a wrong sign shifts every conv tap and blows well past the tolerance).
_ROLL_SIGN = None


def _roll_sign():
    """+1 if pltpu.roll matches jnp.roll (result[i] = x[i - shift]), else -1 (decided once on-device)."""
    global _ROLL_SIGN
    if _ROLL_SIGN is None:
        def k(x_ref, o_ref):
            o_ref[...] = pltpu.roll(x_ref[...], 1, 1)

        x = jnp.arange(2 * 128, dtype=jnp.float32).reshape(2, 128)
        y = jax.device_get(pl.pallas_call(
            k, out_shape=jax.ShapeDtypeStruct((2, 128), jnp.float32))(x))
        _ROLL_SIGN = 1 if abs(float(y[0, 0]) - 127.0) < 0.5 else -1
    return _ROLL_SIGN


# --------------------------------------------------------------------------- model plan + packed constants
def _build_plan(conv_params, head_params, B):
    consts = []

    def add(a):
        consts.append(a)
        return len(consts) - 1

    cfg_blocks, blk = [], []
    for v in VGG19_CFG:
        if v == 'M':
            cfg_blocks.append(blk)
            blk = []
        else:
            blk.append(v)

    levels = []
    c = IN_CHANNELS
    H = W = IMG
    it = iter(conv_params)
    for widths in cfg_blocks:
        HW = H * W
        PW = B * HW                               # packed lane width: B images side by side
        lvl = {'W': W, 'HW': HW, 'PW': PW, 'convs': []}

        # ---- conv tap mechanism (threshold on the PACKED width)
        if PW >= 128:
            lvl['mech'] = 'roll'
            # per-image validity mask tiled B times; zeros any lane crossing an image boundary
            lvl['mask'] = add(jnp.asarray(np.tile(_make_masks(H, W), (1, 1, B))))       # f32 (9,1,PW)
        else:
            lvl['mech'] = 'mat'
            T = _make_shift_mats(H, W)
            Tp = np.stack([_blockdiag(T[t], B) for t in range(9)])
            lvl['T'] = add(jnp.asarray(Tp, jnp.bfloat16))                               # bf16 (9,PW,PW)

        for width in widths:
            w, b = next(it)
            w9, bb = _pack_conv(w, b, c, width, _pad8(c), _pad8(width))
            lvl['convs'].append({'w': add(w9), 'b': add(bb)})
            c = width

        # ---- 2x2/2 maxpool mechanism
        S = _make_pool_select(H, W)
        if PW >= 128:
            lvl['pool'] = 'rollsel'
            if HW % 128 == 0:
                # per-image select applied to lane-aligned slices (no O(B^2) constant)
                lvl['per_slice'] = True
                lvl['S'] = add(jnp.asarray(S, jnp.bfloat16))                            # (HW, HW/4)
            else:
                lvl['per_slice'] = False
                lvl['S'] = add(jnp.asarray(_blockdiag(S, B), jnp.bfloat16))             # (PW, PW/4)
        else:
            lvl['pool'] = 'mat'
            G = _make_pool_gathers(H, W)
            Gp = np.stack([_blockdiag(G[p], B) for p in range(4)])
            lvl['G'] = add(jnp.asarray(Gp, jnp.bfloat16))                               # (4,PW,PW/4)

        levels.append(lvl)
        H //= 2
        W //= 2

    # ---- classifier head, packed for the (features-on-sublane, batch-on-lane) layout
    w1, b1, w2, b2 = head_params
    w2t = np.zeros((NUM_CLASSES_PAD, HIDDEN), np.float32)
    w2t[:NUM_CLASSES] = np.asarray(w2, np.float32).T
    b2p = np.zeros((NUM_CLASSES_PAD, 1), np.float32)
    b2p[:NUM_CLASSES, 0] = np.asarray(b2, np.float32)
    head = {
        'w1t': add(jnp.asarray(np.asarray(w1, np.float32).T, jnp.bfloat16)),            # (1024, 32)
        'b1': add(jnp.asarray(b1, jnp.float32).reshape(HIDDEN, 1)),                     # (1024, 1)
        'w2t': add(jnp.asarray(w2t, jnp.bfloat16)),                                     # (16, 1024)
        'b2': add(jnp.asarray(b2p, jnp.float32)),                                       # (16, 1)
    }
    return levels, head, consts


# --------------------------------------------------------------------------- fused forward (one pallas_call)
def make_vgg_forward(conv_params, head_params, batch_block=4):
    """batch_block = images packed per grid step (keep <= ceil(N/2) so v7x's 2 TCs both get work)."""
    B = int(batch_block)
    assert B >= 1
    levels, head, consts = _build_plan(conv_params, head_params, B)
    roll_sign = _roll_sign()
    c0p = _pad8(IN_CHANNELS)              # input channels zero-padded 3 -> 8 (sublane-aligned taps)
    HW0 = IMG * IMG
    PW0 = B * HW0

    def kernel(x_ref, *refs):
        o_ref = refs[-1]
        cref = refs[:-1]

        def src(v, s, size):
            """result[:, i] = v[:, (i + s) % size] (cyclic lane shift; wrapped lanes get masked)."""
            sh = ((-s) if roll_sign > 0 else s) % size
            return pltpu.roll(v, sh, 1) if sh else v

        act = x_ref[0]                                               # (8, B*1024) f32, images lane-packed
        for lvl in levels:
            W, HW, PW = lvl['W'], lvl['HW'], lvl['PW']

            for cv in lvl['convs']:
                if lvl['mech'] == 'roll':
                    mref = cref[lvl['mask']]                         # (9, 1, PW) f32
                    taps = jnp.concatenate(
                        [src(act, dy * W + dx, PW) * mref[t]
                         for t, (dy, dx) in enumerate(OFFS)], axis=0)
                else:
                    tref = cref[lvl['T']]                            # (9, PW, PW) bf16 block-diag shifts
                    act_bf = act.astype(jnp.bfloat16)
                    taps = jnp.concatenate(
                        [jnp.dot(act_bf, tref[t], preferred_element_type=jnp.float32)
                         for t in range(9)], axis=0)
                acc = jnp.dot(cref[cv['w']][...], taps.astype(jnp.bfloat16),
                              preferred_element_type=jnp.float32)    # (Cout_p, PW) f32
                act = jnp.maximum(acc + cref[cv['b']][...], 0.0)     # bias + ReLU (f32)

            if lvl['pool'] == 'rollsel':
                # 2x2 window max via rolls (anchors never read across image boundaries),
                # then a bf16 0/1 select matmul compacts to the pooled grid.
                m1 = jnp.maximum(act, src(act, 1, PW))
                m2 = jnp.maximum(m1, src(m1, W, PW)).astype(jnp.bfloat16)
                S = cref[lvl['S']][...]                              # bf16
                if lvl['per_slice']:
                    act = jnp.concatenate(
                        [jnp.dot(m2[:, b * HW:(b + 1) * HW], S,
                                 preferred_element_type=jnp.float32)
                         for b in range(B)], axis=1)
                else:
                    act = jnp.dot(m2, S, preferred_element_type=jnp.float32)
            else:  # tiny maps: 4 block-diagonal bf16 gather matmuls + max
                gref = cref[lvl['G']]                                # (4, PW, PW/4) bf16
                act_bf = act.astype(jnp.bfloat16)
                pooled = jnp.dot(act_bf, gref[0], preferred_element_type=jnp.float32)
                for p in range(1, 4):
                    pooled = jnp.maximum(
                        pooled, jnp.dot(act_bf, gref[p], preferred_element_type=jnp.float32))
                act = pooled

        # AdaptiveAvgPool2d((1,1)) on a 1x1 map + flatten == identity; Dropout(eval) == identity.
        # Batched MXU classifier, features on sublanes / batch on lanes.
        feat = act.astype(jnp.bfloat16)                              # (32, B)
        h = jnp.dot(cref[head['w1t']][...], feat,
                    preferred_element_type=jnp.float32) + cref[head['b1']][...]     # (1024, B)
        h = jnp.where(h > 0.0, h, 0.01 * h)                          # LeakyReLU(0.01)
        out = jnp.dot(cref[head['w2t']][...], h.astype(jnp.bfloat16),
                      preferred_element_type=jnp.float32) + cref[head['b2']][...]   # (16, B)
        o_ref[0] = out

    const_specs = [
        pl.BlockSpec(a.shape, lambda n, _nd=a.ndim: (0,) * _nd) for a in consts
    ]

    def forward(x):                                                  # x: (N, 3, 32, 32) f32, NCHW
        N = x.shape[0]
        G = -(-N // B)                                               # grid steps
        Np = G * B
        xk = x.reshape(N, IN_CHANNELS, HW0).astype(jnp.float32)      # NCHW -> (N, C, H*W)
        xk = jnp.pad(xk, ((0, Np - N), (0, c0p - IN_CHANNELS), (0, 0)))
        # lane-pack B images per grid step: (G, c0p, B*HW0), image b at lanes [b*HW0, (b+1)*HW0)
        xk = xk.reshape(G, B, c0p, HW0).transpose(0, 2, 1, 3).reshape(G, c0p, PW0)
        out = pl.pallas_call(
            kernel,
            out_shape=jax.ShapeDtypeStruct((G, NUM_CLASSES_PAD, B), jnp.float32),
            grid=(G,),
            in_specs=[pl.BlockSpec((1, c0p, PW0), lambda n: (n, 0, 0))] + const_specs,
            out_specs=pl.BlockSpec((1, NUM_CLASSES_PAD, B), lambda n: (n, 0, 0)),
            compiler_params=pltpu.CompilerParams(
                dimension_semantics=("parallel",),
                vmem_limit_bytes=32 * 1024 * 1024),
        )(xk, *consts)
        out = jnp.transpose(out, (0, 2, 1)).reshape(Np, NUM_CLASSES_PAD)
        return out[:N, :NUM_CLASSES]

    return jax.jit(forward)


# --------------------------------------------------------------------------- parameter init (deterministic)
def init_params(key):
    conv_params = []
    c = IN_CHANNELS
    for v in VGG19_CFG:
        if v == 'M':
            continue
        key, kw = jax.random.split(key)
        std = math.sqrt(2.0 / (9 * c))
        w = jax.random.normal(kw, (3, 3, c, v), jnp.float32) * std   # HWIO
        b = jnp.zeros((v,), jnp.float32)
        conv_params.append((w, b))
        c = v
    num_features = c    # final conv channel count, fed to the classifier
    key, k1, k2 = jax.random.split(key, 3)
    w1 = jax.random.normal(k1, (num_features, HIDDEN), jnp.float32) * math.sqrt(2.0 / num_features)
    b1 = jnp.zeros((HIDDEN,), jnp.float32)
    w2 = jax.random.normal(k2, (HIDDEN, NUM_CLASSES), jnp.float32) * math.sqrt(2.0 / HIDDEN)
    b2 = jnp.zeros((NUM_CLASSES,), jnp.float32)
    return conv_params, (w1, b1, w2, b2)


# --------------------------------------------------------------------------- pure-JAX reference
def reference_forward(x_nchw, conv_params, head_params):
    # Same bf16-operand / f32-accumulation convention as the kernel, so only accumulation
    # order differs (well within the test tolerance).
    x = jnp.transpose(x_nchw, (0, 2, 3, 1))                          # NHWC
    ci = 0
    for v in VGG19_CFG:
        if v == 'M':
            x = jax.lax.reduce_window(x, -jnp.inf, jax.lax.max,
                                      (1, 2, 2, 1), (1, 2, 2, 1), 'VALID')
        else:
            w, b = conv_params[ci]
            ci += 1
            x = jax.lax.conv_general_dilated(
                x.astype(jnp.bfloat16), w.astype(jnp.bfloat16),
                window_strides=(1, 1), padding='SAME',
                dimension_numbers=('NHWC', 'HWIO', 'NHWC'),
                preferred_element_type=jnp.float32)
            x = jnp.maximum(x + b, 0.0)
    x = jnp.mean(x, axis=(1, 2))                                     # avgpool (1,1) + flatten
    w1, b1, w2, b2 = head_params
    h = jnp.dot(x.astype(jnp.bfloat16), w1.astype(jnp.bfloat16),
                preferred_element_type=jnp.float32) + b1
    h = jnp.where(h > 0, h, 0.01 * h)
    return jnp.dot(h.astype(jnp.bfloat16), w2.astype(jnp.bfloat16),
                   preferred_element_type=jnp.float32) + b2


if __name__ == "__main__":
    key = jax.random.PRNGKey(0)
    key, kx, kp = jax.random.split(key, 3)

    N = 8
    x = jax.random.normal(kx, (N, IN_CHANNELS, IMG, IMG), jnp.float32)   # NCHW, like the PyTorch module
    conv_params, head_params = init_params(kp)

    # 4 images lane-packed per grid step -> grid of 2 "parallel" steps (feeds both v7x TCs).
    fwd = make_vgg_forward(conv_params, head_params, batch_block=4)
    out = jax.block_until_ready(fwd(x))

    assert out.shape == (N, NUM_CLASSES), out.shape
    assert bool(jnp.all(jnp.isfinite(out)))
    ref = reference_forward(x, conv_params, head_params)
    err = float(jnp.max(jnp.abs(out - ref)))
    assert jnp.allclose(out, ref, atol=2e-2, rtol=2e-2), err

    print("KERNEL_OK")
</pallas_src>

<mosaic_0001>
module attributes {stable_mosaic.version = 11 : i64} {
  func.func @k(%arg0: memref<2x128xf32, #tpu.memory_space<vmem>>, %arg1: memref<2x128xf32, #tpu.memory_space<vmem>>) attributes {dimension_semantics = [], scalar_prefetch = 0 : i64, scratch_operands = 0 : i64, tpu.core_type = #tpu.core_type<tc>} {
    %c0 = arith.constant 0 : index
    %c0_0 = arith.constant 0 : index
    %0 = vector.load %arg0[%c0, %c0_0] : memref<2x128xf32, #tpu.memory_space<vmem>>, vector<2x128xf32>
    %c1_i32 = arith.constant 1 : i32
    %1 = tpu.dynamic_rotate %0 by %c1_i32 dim 1 : vector<2x128xf32>, i32 -> vector<2x128xf32>
    %c0_1 = arith.constant 0 : index
    %c0_2 = arith.constant 0 : index
    %2 = vector.load %arg1[%c0_1, %c0_2] : memref<2x128xf32, #tpu.memory_space<vmem>>, vector<2x128xf32>
    tpu.vector_store %arg1[%c0_1, %c0_2], %1 {strides = array<i32>} : memref<2x128xf32, #tpu.memory_space<vmem>>, vector<2x128xf32>,
    return
  }
}

</mosaic_0001>

<bundles_post_ra>
// kernel: tpu_custom_call.1
= control target key start
LH: loop header
LB: loop body
LE: loop exit
PB: predicated region body
PF: predicated region fallthrough
CT: control target
= control target key end

     0   :  { %6 = vsyncpa [#allocation3], 0  ;;  %s118_s0 = inlined_call_operand.hbm [shape: f32[2,128], index: 0, kind: input, shape index: {}]   ;;  %s119_s1 = inlined_call_operand.hbm [shape: f32[2,128], index: 1, kind: output, shape index: {}]  }
   0x1   :  { %7 = vsyncpa [#allocation4], 0  ;;  %s13_s8 = sshll.u32 %s118_s0, 4  ;;  %s99_s9 = smov [#allocation2]   ;;  %s14_s8 = int_to_ptr.hbm [resolvable:$true] %s13_s8 }
   0x2   :  { %s15_s10 = sshll.u32 %s99_s9, 4  ;;  %s16_s10 = int_to_ptr.vmem [resolvable:$true] %s15_s10 }
   0x3   :  { %18 = dma.hbm_to_vmem [thread:$0]  %s14_s8, 32, %s16_s10, [#allocation3]  }
   0x4   :  { %95 = dma.done.wait [#allocation3], 32  }
   0x5   :  { %96 = vsyncadd [#allocation3], 4294967264  ;;  %v23_v0 = vld [vmem:[#allocation2] sm:$0x3]  ;;  %s100_s11 = smov 1   ;;  %s101_s12 = smov [#allocation5]  }
   0x6   :  { %24 = vrot.lane.b32.xlu0 %v23_v0, %s100_s11  ;;  %s32_s13 = sshll.u32 %s101_s12, 4  ;;  %s34_s16 = sshll.u32 %s119_s1, 4  ;;  %s33_s13 = int_to_ptr.vmem [resolvable:$true] %s32_s13  ;;  %s35_s16 = int_to_ptr.hbm [resolvable:$true] %s34_s16 }
  0x78   :  { %v25_v1 = vpop.permute.xlu0 %24 }
  0x79   :  { %26 = vst [vmem:[#allocation5] sm:$0x3] %v25_v1 }
  0x7a   :  { %37 = dma.vmem_to_hbm [thread:$0]  %s33_s13, 32, %s35_s16, [#allocation4]  }
  0x7b   :  { %97 = dma.done.wait [#allocation4], 32  }
  0x7c   :  { %98 = vsyncadd [#allocation4], 4294967264 }
  0x7d   :  { %42 = vsyncpa [#allocation3], 1 }
  0x7e   :  { %43 = vsyncpa [#allocation4], 1 }

</bundles_post_ra>
